<compile_context>
chip_gen: v5e
topology: v5e:2x2
jax: 0.10.0
libtpu: 0.0.40
codegen_flags: <defaults>
</compile_context>

<pallas_src>
import functools
import math

import jax
import jax.numpy as jnp
from jax.experimental import pallas as pl
from jax.experimental.pallas import tpu as pltpu


def _crf_kernel(gr_ref, gc_ref, cr_ref, cc_ref, pr_ref, pc_ref, o_ref, b_sc,
                *, w1, w2, shift, fold_w1, fold_w2):
    # gr: (1, T, Cg+4)  augmented guidance rows  (depends on n, a)
    # gc: (1, Cg+4, T)  augmented guidance cols  (depends on n, b)
    # cr: (1, T, Ck)    NEGATED cluster rows
    # cc: (1, Ck, T)    cluster cols
    # pr: (T, 4)        coord-only row features  (batch-invariant)
    # pc: (4, T)        coord-only col features  (batch-invariant)
    # b_sc: (T, T) VMEM scratch holding w2*exp(-cd/2g) - shift for this (a,b)

    @pl.when(pl.program_id(2) == 0)
    def _():
        ce = jnp.dot(pr_ref[...], pc_ref[...],
                     preferred_element_type=jnp.float32)        # [T, T]
        eb = jnp.exp(ce)
        if not fold_w2:                 # static branch (only when w2 <= 0)
            eb = jnp.float32(w2) * eb
        b_sc[...] = eb - jnp.float32(shift)

    # One MXU matmul yields the full exponent log(w1) - cd/2a - ||dg||^2/2b.
    e = jnp.exp(jnp.dot(gr_ref[0], gc_ref[0],
                        preferred_element_type=jnp.float32))    # [T, T]
    if not fold_w1:                     # static branch (only when w1 <= 0)
        e = jnp.float32(w1) * e
    sim = e + b_sc[...]

    # Row operand was pre-negated in the wrapper -> this is -(cluster_sims).
    neg_cluster = jnp.dot(cr_ref[0], cc_ref[0],
                          preferred_element_type=jnp.float32)   # [T, T]
    o_ref[0] = (neg_cluster * sim).astype(o_ref.dtype)


def _pick_tile(sp):
    # Sp is a multiple of 128; footprint at tile=1024 is only ~13 MB, which
    # fits every generation (v7x 64 MiB physical VMEM included).
    for t in (1024, 512, 256, 128):
        if sp % t == 0:
            return t
    return 128


def contrastive_crf_loss(guidance, clusters, coords, *,
                         alpha, beta, gamma, w1, w2, shift):
    """guidance: [N,Cg,H,W], clusters: [N,Ck,H,W], coords: int32 [2,S]."""
    assert guidance.shape[0] == clusters.shape[0]
    assert guidance.shape[2:] == clusters.shape[2:]
    N, Cg, H, W = guidance.shape
    Ck = clusters.shape[1]
    S = coords.shape[1]

    LANE = 128
    Sp = ((S + LANE - 1) // LANE) * LANE
    pad = Sp - S
    tile = _pick_tile(Sp)
    ka = Cg + 4

    # ---------------- plain-JAX glue (gather + operand construction) -------
    # Flattened 1-D take (cheaper than 2-D advanced-index gather on TPU).
    flat_idx = (coords[0] * W + coords[1]).astype(jnp.int32)            # [S]
    sel_g = jnp.take(guidance.reshape(N, Cg, H * W).astype(jnp.float32),
                     flat_idx, axis=2)                                  # [N,Cg,S]
    sel_c = jnp.take(clusters.reshape(N, Ck, H * W).astype(jnp.float32),
                     flat_idx, axis=2)                                  # [N,Ck,S]

    inv_sqrt_2beta = 1.0 / math.sqrt(2.0 * float(beta))
    inv_sqrt_2alpha = 1.0 / math.sqrt(2.0 * float(alpha))
    inv_sqrt_2gamma = 1.0 / math.sqrt(2.0 * float(gamma))

    gt = sel_g * jnp.float32(inv_sqrt_2beta)                            # [N,Cg,S]
    sq_g = jnp.sum(gt * gt, axis=1, keepdims=True)                      # [N,1,S]

    cf = coords.astype(jnp.float32)                                     # [2,S]  (f32 before squaring)
    xa = cf * jnp.float32(inv_sqrt_2alpha)                              # [2,S]
    xg = cf * jnp.float32(inv_sqrt_2gamma)                              # [2,S]
    sq_xa = jnp.sum(xa * xa, axis=0, keepdims=True)                     # [1,S]
    sq_xg = jnp.sum(xg * xg, axis=0, keepdims=True)                     # [1,S]

    fold_w1 = float(w1) > 0.0
    log_w1 = math.log(float(w1)) if fold_w1 else 0.0
    fold_w2 = float(w2) > 0.0
    log_w2 = math.log(float(w2)) if fold_w2 else 0.0

    ones_n = jnp.ones((N, 1, S), jnp.float32)
    xa_b = jnp.broadcast_to(xa[None], (N, 2, S))                        # [N,2,S]
    col_norm = sq_g + sq_xa                                             # [N,1,S]

    # Column-side (index b) augmented features: [g, x, y, -(||g||^2+x^2+y^2), 1]
    gc_aug = jnp.concatenate([gt, xa_b, -col_norm, ones_n], axis=1)     # [N,ka,S]
    # Row-side (index a): [2g, 2x, 2y, 1, log(w1) - (||g||^2+x^2+y^2)]
    gr_aug = jnp.transpose(
        jnp.concatenate([2.0 * gt, 2.0 * xa_b, ones_n,
                         jnp.float32(log_w1) - col_norm], axis=1),
        (0, 2, 1))                                                      # [N,S,ka]

    # Coordinate-only features for the w2-kernel (batch-invariant, tiny).
    ones_1 = jnp.ones((1, S), jnp.float32)
    pc = jnp.concatenate([xg, -sq_xg, ones_1], axis=0)                  # [4,S]
    pr = jnp.transpose(
        jnp.concatenate([2.0 * xg, ones_1,
                         jnp.float32(log_w2) - sq_xg], axis=0), (1, 0)) # [S,4]

    cc = sel_c                                                          # [N,Ck,S]
    cr_neg = -jnp.transpose(sel_c, (0, 2, 1))                           # [N,S,Ck]

    # Pad sample axis to a lane-dense multiple of 128 (zeros are harmless:
    # padded exponents are 0 -> exp = 1, padded cluster gram is 0).
    gr_aug = jnp.pad(gr_aug, ((0, 0), (0, pad), (0, 0)))
    gc_aug = jnp.pad(gc_aug, ((0, 0), (0, 0), (0, pad)))
    cr_neg = jnp.pad(cr_neg, ((0, 0), (0, pad), (0, 0)))
    cc = jnp.pad(cc, ((0, 0), (0, 0), (0, pad)))
    pr = jnp.pad(pr, ((0, pad), (0, 0)))
    pc = jnp.pad(pc, ((0, 0), (0, pad)))

    # Right-sized VMEM budget: double-buffered out + scratch + small operands.
    vmem_est = (2 * tile * tile * 4          # output double buffer
                + tile * tile * 4            # b_sc scratch
                + 4 * tile * ka * 4          # gr/gc double-buffered
                + 4 * tile * Ck * 4          # cr/cc double-buffered
                + 4 * tile * 4 * 4)          # pr/pc double-buffered
    vmem_limit = min(max(2 * vmem_est, 16 * 1024 * 1024), 64 * 1024 * 1024)

    kernel = functools.partial(_crf_kernel, w1=float(w1), w2=float(w2),
                               shift=float(shift),
                               fold_w1=fold_w1, fold_w2=fold_w2)

    n_tiles = Sp // tile
    out = pl.pallas_call(
        kernel,
        out_shape=jax.ShapeDtypeStruct((N, Sp, Sp), jnp.float32),
        grid_spec=pltpu.PrefetchScalarGridSpec(
            num_scalar_prefetch=0,
            # n innermost: b_sc scratch (computed at n==0) is reused across
            # the whole batch for each (a,b) tile.
            grid=(n_tiles, n_tiles, N),
            in_specs=[
                pl.BlockSpec((1, tile, ka), lambda a, b, n: (n, a, 0)),
                pl.BlockSpec((1, ka, tile), lambda a, b, n: (n, 0, b)),
                pl.BlockSpec((1, tile, Ck), lambda a, b, n: (n, a, 0)),
                pl.BlockSpec((1, Ck, tile), lambda a, b, n: (n, 0, b)),
                pl.BlockSpec((tile, 4), lambda a, b, n: (a, 0)),
                pl.BlockSpec((4, tile), lambda a, b, n: (0, b)),
            ],
            out_specs=pl.BlockSpec((1, tile, tile), lambda a, b, n: (n, a, b)),
            scratch_shapes=[pltpu.VMEM((tile, tile), jnp.float32)],
        ),
        compiler_params=pltpu.CompilerParams(
            # n must stay "arbitrary" so a v7x megacore split cannot break the
            # pl.when(n==0) scratch initialization / residency.
            dimension_semantics=("parallel", "parallel", "arbitrary"),
            vmem_limit_bytes=vmem_limit),
    )(gr_aug, gc_aug, cr_neg, cc, pr, pc)

    return out[:, :S, :S]


def _reference(guidance, clusters, coords, *, alpha, beta, gamma, w1, w2, shift):
    sel_g = guidance[:, :, coords[0, :], coords[1, :]]
    sel_c = clusters[:, :, coords[0, :], coords[1, :]]
    coord_diff = jnp.sum(
        (coords[:, :, None] - coords[:, None, :]) ** 2, axis=0
    )[None].astype(jnp.float32)
    guidance_diff = jnp.sum(
        (sel_g[:, :, :, None] - sel_g[:, :, None, :]) ** 2, axis=1)
    sim_kernel = (w1 * jnp.exp(-coord_diff / (2 * alpha) - guidance_diff / (2 * beta))
                  + w2 * jnp.exp(-coord_diff / (2 * gamma)) - shift)
    cluster_sims = jnp.einsum('nka,nkb->nab', sel_c, sel_c)
    return -(cluster_sims * sim_kernel)


if __name__ == "__main__":
    # Module hyper-parameters (deterministic, in-script).
    n_samples, alpha, beta, gamma = 8, 0.5, 0.15, 0.25
    w1, w2, shift = 10.0, 3.0, 0.0

    N, Cg, Ck, H, W = 2, 4, 6, 16, 16

    key = jax.random.PRNGKey(0)
    kg, kc, kh, kw = jax.random.split(key, 4)
    guidance = jax.random.normal(kg, (N, Cg, H, W), dtype=jnp.float32)
    clusters = jax.random.normal(kc, (N, Ck, H, W), dtype=jnp.float32)
    # TODO(synk): torch.randint coordinate sampling stays host-side JAX glue
    # (random gather has no useful in-kernel equivalent here).
    coords = jnp.concatenate(
        [jax.random.randint(kh, (1, n_samples), 0, H),
         jax.random.randint(kw, (1, n_samples), 0, W)], axis=0).astype(jnp.int32)

    out = contrastive_crf_loss(
        guidance, clusters, coords,
        alpha=alpha, beta=beta, gamma=gamma, w1=w1, w2=w2, shift=shift)
    out = jax.block_until_ready(out)

    ref = _reference(
        guidance, clusters, coords,
        alpha=alpha, beta=beta, gamma=gamma, w1=w1, w2=w2, shift=shift)
    assert out.shape == (N, n_samples, n_samples)
    assert jnp.allclose(out, ref, rtol=1e-3, atol=1e-3)

    print("KERNEL_OK")
</pallas_src>

<mosaic_0001>
module attributes {stable_mosaic.version = 11 : i64} {
  func.func @_crf_kernel(%arg0: i32, %arg1: i32, %arg2: i32, %arg3: memref<1x128x8xf32, #tpu.memory_space<vmem>>, %arg4: memref<1x8x128xf32, #tpu.memory_space<vmem>>, %arg5: memref<1x128x6xf32, #tpu.memory_space<vmem>>, %arg6: memref<1x6x128xf32, #tpu.memory_space<vmem>>, %arg7: memref<128x4xf32, #tpu.memory_space<vmem>>, %arg8: memref<4x128xf32, #tpu.memory_space<vmem>>, %arg9: memref<1x128x128xf32, #tpu.memory_space<vmem>>, %arg10: memref<128x128xf32, #tpu.memory_space<vmem>>) attributes {dimension_semantics = [#tpu.dimension_semantics<parallel>, #tpu.dimension_semantics<parallel>, #tpu.dimension_semantics<arbitrary>], iteration_bounds = array<i64: 1, 1, 2>, scalar_prefetch = 0 : i64, scratch_operands = 1 : i64, tpu.core_type = #tpu.core_type<tc>, window_params = [{transform_indices = @transform_0, window_bounds = array<i64: 1, 128, 8>}, {transform_indices = @transform_1, window_bounds = array<i64: 1, 8, 128>}, {transform_indices = @transform_2, window_bounds = array<i64: 1, 128, 6>}, {transform_indices = @transform_3, window_bounds = array<i64: 1, 6, 128>}, {transform_indices = @transform_4, window_bounds = array<i64: 128, 4>}, {transform_indices = @transform_5, window_bounds = array<i64: 4, 128>}, {transform_indices = @transform_6, window_bounds = array<i64: 1, 128, 128>}]} {
    %c0_i32 = arith.constant 0 : i32
    %0 = arith.cmpi eq, %arg2, %c0_i32 : i32
    %1 = arith.extui %0 : i1 to i32
    %c0_i32_0 = arith.constant 0 : i32
    %2 = arith.cmpi ne, %1, %c0_i32_0 : i32
    scf.if %2 {
      %c0_18 = arith.constant 0 : index
      %c0_19 = arith.constant 0 : index
      %20 = vector.load %arg7[%c0_18, %c0_19] : memref<128x4xf32, #tpu.memory_space<vmem>>, vector<128x4xf32>
      %c0_20 = arith.constant 0 : index
      %c0_21 = arith.constant 0 : index
      %21 = vector.load %arg8[%c0_20, %c0_21] : memref<4x128xf32, #tpu.memory_space<vmem>>, vector<4x128xf32>
      %cst_22 = arith.constant dense<0.000000e+00> : vector<128x128xf32>
      %22 = tpu.matmul %20, %21, %cst_22 {dimension_numbers = #tpu.dot_dimension_numbers<[1], [0], [0], [1], [0, 0, 1, 1], [], []>} : vector<128x4xf32>, vector<4x128xf32>, vector<128x128xf32> -> vector<128x128xf32>
      %23 = math.exp %22 : vector<128x128xf32>
      %cst_23 = arith.constant 0.000000e+00 : f32
      %24 = vector.broadcast %cst_23 : f32 to vector<128x128xf32>
      %25 = arith.subf %23, %24 : vector<128x128xf32>
      %c0_24 = arith.constant 0 : index
      %c0_25 = arith.constant 0 : index
      %26 = vector.load %arg10[%c0_24, %c0_25] : memref<128x128xf32, #tpu.memory_space<vmem>>, vector<128x128xf32>
      tpu.vector_store %arg10[%c0_24, %c0_25], %25 {strides = array<i32>} : memref<128x128xf32, #tpu.memory_space<vmem>>, vector<128x128xf32>,
    } else {
    }
    %c0 = arith.constant 0 : index
    %c0_1 = arith.constant 0 : index
    %c0_2 = arith.constant 0 : index
    %3 = vector.load %arg3[%c0, %c0_1, %c0_2] : memref<1x128x8xf32, #tpu.memory_space<vmem>>, vector<1x128x8xf32>
    %4 = vector.shape_cast %3 : vector<1x128x8xf32> to vector<128x8xf32>
    %c0_3 = arith.constant 0 : index
    %c0_4 = arith.constant 0 : index
    %c0_5 = arith.constant 0 : index
    %5 = vector.load %arg4[%c0_3, %c0_4, %c0_5] : memref<1x8x128xf32, #tpu.memory_space<vmem>>, vector<1x8x128xf32>
    %6 = vector.shape_cast %5 : vector<1x8x128xf32> to vector<8x128xf32>
    %cst = arith.constant dense<0.000000e+00> : vector<128x128xf32>
    %7 = tpu.matmul %4, %6, %cst {dimension_numbers = #tpu.dot_dimension_numbers<[1], [0], [0], [1], [0, 0, 1, 1], [], []>} : vector<128x8xf32>, vector<8x128xf32>, vector<128x128xf32> -> vector<128x128xf32>
    %8 = math.exp %7 : vector<128x128xf32>
    %c0_6 = arith.constant 0 : index
    %c0_7 = arith.constant 0 : index
    %9 = vector.load %arg10[%c0_6, %c0_7] : memref<128x128xf32, #tpu.memory_space<vmem>>, vector<128x128xf32>
    %10 = arith.addf %8, %9 : vector<128x128xf32>
    %c0_8 = arith.constant 0 : index
    %c0_9 = arith.constant 0 : index
    %c0_10 = arith.constant 0 : index
    %11 = vector.load %arg5[%c0_8, %c0_9, %c0_10] : memref<1x128x6xf32, #tpu.memory_space<vmem>>, vector<1x128x6xf32>
    %12 = vector.shape_cast %11 : vector<1x128x6xf32> to vector<128x6xf32>
    %c0_11 = arith.constant 0 : index
    %c0_12 = arith.constant 0 : index
    %c0_13 = arith.constant 0 : index
    %13 = vector.load %arg6[%c0_11, %c0_12, %c0_13] : memref<1x6x128xf32, #tpu.memory_space<vmem>>, vector<1x6x128xf32>
    %14 = vector.shape_cast %13 : vector<1x6x128xf32> to vector<6x128xf32>
    %cst_14 = arith.constant dense<0.000000e+00> : vector<128x128xf32>
    %15 = tpu.matmul %12, %14, %cst_14 {dimension_numbers = #tpu.dot_dimension_numbers<[1], [0], [0], [1], [0, 0, 1, 1], [], []>} : vector<128x6xf32>, vector<6x128xf32>, vector<128x128xf32> -> vector<128x128xf32>
    %16 = arith.mulf %15, %10 : vector<128x128xf32>
    %c0_15 = arith.constant 0 : index
    %c0_16 = arith.constant 0 : index
    %c0_17 = arith.constant 0 : index
    %17 = vector.load %arg9[%c0_15, %c0_16, %c0_17] : memref<1x128x128xf32, #tpu.memory_space<vmem>>, vector<1x128x128xf32>
    %18 = vector.shape_cast %17 : vector<1x128x128xf32> to vector<128x128xf32>
    %19 = vector.shape_cast %16 : vector<128x128xf32> to vector<1x128x128xf32>
    tpu.vector_store %arg9[%c0_15, %c0_16, %c0_17], %19 {strides = array<i32>} : memref<1x128x128xf32, #tpu.memory_space<vmem>>, vector<1x128x128xf32>,
    return
  }
  func.func @transform_0(%arg0: i32, %arg1: i32, %arg2: i32) -> (i32, i32, i32) {
    %c0_i32 = arith.constant 0 : i32
    %c0_i32_0 = arith.constant 0 : i32
    return %arg2, %arg0, %c0_i32 : i32, i32, i32
  }
  func.func @transform_1(%arg0: i32, %arg1: i32, %arg2: i32) -> (i32, i32, i32) {
    %c0_i32 = arith.constant 0 : i32
    %c0_i32_0 = arith.constant 0 : i32
    return %arg2, %c0_i32, %arg1 : i32, i32, i32
  }
  func.func @transform_2(%arg0: i32, %arg1: i32, %arg2: i32) -> (i32, i32, i32) {
    %c0_i32 = arith.constant 0 : i32
    %c0_i32_0 = arith.constant 0 : i32
    return %arg2, %arg0, %c0_i32 : i32, i32, i32
  }
  func.func @transform_3(%arg0: i32, %arg1: i32, %arg2: i32) -> (i32, i32, i32) {
    %c0_i32 = arith.constant 0 : i32
    %c0_i32_0 = arith.constant 0 : i32
    return %arg2, %c0_i32, %arg1 : i32, i32, i32
  }
  func.func @transform_4(%arg0: i32, %arg1: i32, %arg2: i32) -> (i32, i32) {
    %c0_i32 = arith.constant 0 : i32
    %c0_i32_0 = arith.constant 0 : i32
    return %arg0, %c0_i32 : i32, i32
  }
  func.func @transform_5(%arg0: i32, %arg1: i32, %arg2: i32) -> (i32, i32) {
    %c0_i32 = arith.constant 0 : i32
    %c0_i32_0 = arith.constant 0 : i32
    return %c0_i32, %arg1 : i32, i32
  }
  func.func @transform_6(%arg0: i32, %arg1: i32, %arg2: i32) -> (i32, i32, i32) {
    %c0_i32 = arith.constant 0 : i32
    return %arg2, %arg0, %arg1 : i32, i32, i32
  }
}

</mosaic_0001>

<bundles_post_ra>
// kernel: tpu_custom_call.1
= control target key start
LH: loop header
LB: loop body
LE: loop exit
PB: predicated region body
PF: predicated region fallthrough
CT: control target
= control target key end

     0   :  { %11 = vsyncpa [#allocation4], 0  ;;  %s1737_s0 = inlined_call_operand.vmem [shape: f32[2,128,8], index: 0, kind: input, shape index: {}]   ;;  %s1738_s1 = inlined_call_operand.vmem [shape: f32[2,8,128], index: 1, kind: input, shape index: {}]   ;;  %s1739_s2 = inlined_call_operand.vmem [shape: f32[2,128,6], index: 2, kind: input, shape index: {}]   ;;  %s1740_s3 = inlined_call_operand.vmem [shape: f32[2,6,128], index: 3, kind: input, shape index: {}]   ;;  %s1741_s4 = inlined_call_operand.vmem [shape: f32[128,4], index: 4, kind: input, shape index: {}]   ;;  %s1742_s5 = inlined_call_operand.vmem [shape: f32[4,128], index: 5, kind: input, shape index: {}]   ;;  %s1743_s6 = inlined_call_operand.hbm [shape: f32[2,128,128], index: 6, kind: output, shape index: {}]  }
   0x1   :  { %13 = vsyncpa [#allocation4 + $0x1], 0  ;;  %s1466_s21 = smov 0   ;;  %s1468_s22 = smov 0  }
   0x2   :  { %s1470_s23 = smov 0   ;;  %s1472_s24 = smov 0  }
   0x3   :  { %s1474_s25 = smov 0   ;;  %s1476_s26 = smov 0  }
   0x4 LB: > { %1747 = sst [smem:[#allocation6_spill]] %s1423_s25  ;;  %s1150_s27 = sadd.s32 4294967295, %s1427_s26   ;;  %s1427_s26 = sphi %s1476_s26, %s19_s26   ;;  %s1423_s25 = sphi %s1474_s25, %s1753_s25   ;;  %s1419_s24 = sphi %s1472_s24, %s1752_s24   ;;  %s1415_s23 = sphi %s1470_s23, %s1756_s23   ;;  %s1411_s22 = sphi %s1468_s22, %s1755_s22   ;;  %s1407_s21 = sphi %s1466_s21, %s1754_s21  }
   0x5   : > { %s1151_s28 = sadd.s32 4294967294, %s1427_s26   ;;  %s31_s29 = sadd.s32 1, %s1423_s25 }
   0x6   : > { %s213_s30 = sadd.s32 1, %s1415_s23  ;;  %p32_p0 = scmp.ge.s32.totalorder %s31_s29, 2 }
   0x7   : > { %p223_p1 = scmp.ne.s32.totalorder %s1415_s23, %s1411_s22  ;;  %p224_p2 = scmp.eq.s32.totalorder %s1150_s27, 1 }
   0x8   : > { %p229_p3 = scmp.ne.s32.totalorder %s1411_s22, %s1407_s21  ;;  %s1758_s29 = smov (%p32_p0, %s31_s29), 0 }
   0x9   : > { %1748 = sst [smem:[#allocation7_spill]] %s1758_s29  ;;  %p1506_p4 = por %p224_p2, %p223_p1 }
   0xa   : > { %p230_p5 = scmp.eq.s32.totalorder %s1151_s28, 1  ;;  %s206_s8 = ssub.s32 %s1423_s25, %s1758_s29 }
   0xb   : > { %p1156_p6 = scmp.ge.s32.totalorder %s1427_s26, 1  ;;  %p211_p7 = scmp.eq.s32.totalorder %s206_s8, 0 }
   0xc   : > { %p1513_p8 = por %p230_p5, %p229_p3  ;;  %p310_p9 = scmp.lt.s32.totalorder %s1427_s26, 3 }
   0xd   : > { %s1519_s10 = scalar_select %p211_p7, %s1415_s23, %s213_s30  }
   0xe   : > { %p311_p10 = pnand %p1156_p6, %p310_p9 }
   0xf   : > { %s1745_s11 = sand.u32 (!%p311_p10), 1, %s1411_s22   ;;  %p377_p11 = scmp.lt.s32.totalorder (!%p311_p10), %s1419_s24, 1 }
  0x10   : > { %314 = sbr.rel (%p311_p10) target bundleno = 403 (0x193), region = 44  ;;  %s1157_s12 = sshll.u32 (!%p311_p10), %s1745_s11, 7 }
  0x11   : > { %p1164_p12 = scmp.ne.s32.totalorder (!%p311_p10), %s1419_s24, 0 }
  0x15   : > { %s378_s13 = scalar_select %p377_p11, %s1419_s24, 1 }
  0x16   : > { %424 = sbr.rel (%p1164_p12) target bundleno = 196 (0xc4), region = 48 }
  0x17   : > { %s1220_s14 = sshll.u32 %s378_s13, 7  ;;  %s1160_s15 = sshll.u32 %s378_s13, 3 }
  0x18   : > { %s1529_s18 = scalar_lea.vmem %s1737_s0, %s1220_s14  ;;  %s1534_s27 = scalar_lea.vmem %s1738_s1, %s1160_s15 }
  0x19   : > { %s1539_s8 = scalar_lea.vmem %s1739_s2, %s1220_s14  ;;  %s1544_s25 = scalar_lea.vmem %s1740_s3, %s1160_s15 }
  0x1a   : > { %s1546_s13 = scalar_lea.vmem [#allocation3], %s1157_s12 }
  0x1b   : > { %v441_v0 = vld [vmem:[%s1742_s5] sm:$0xf]  ;;  %vm491_vm0 = vcmask 1043456   ;;  %vm442_vm1 = vcmask 31744   ;;  %v434_v5 = vld [vmem:[%s1741_s4 + $0x48] sm:$0xff]  ;;  %v435_v9 = vld [vmem:[%s1741_s4 + $0x50] sm:$0xff] }
  0x1c   : > { %v433_v1 = vld [vmem:[%s1741_s4 + $0x40] sm:$0xff]  ;;  %1224 = vmatpush.msk.msra.mxu2 %vm491_vm0, %v441_v0  ;;  %1225 = vmatpush.msk.msra.mxu3 %vm491_vm0, %v441_v0  ;;  %v438_v6 = vld [vmem:[%s1741_s4 + $0x68] sm:$0xff]  ;;  %v439_v10 = vld [vmem:[%s1741_s4 + $0x70] sm:$0xff] }
  0x1d   : > { %v437_v2 = vld [vmem:[%s1741_s4 + $0x60] sm:$0xff]  ;;  %1174 = vmatmul.msk.f32.vlgmr.msra.gmra.mxu2 %vm442_vm1, %v433_v1  ;;  %1165 = vmatpush.msk.msra.mxu0 %vm491_vm0, %v441_v0  ;;  %v426_v7 = vld [vmem:[%s1741_s4 + $0x8] sm:$0xff]  ;;  %v427_v11 = vld [vmem:[%s1741_s4 + $0x10] sm:$0xff] }
  0x1e   : > { %v425_v3 = vld [vmem:[%s1741_s4] sm:$0xff]  ;;  %1178 = vmatmul.msk.f32.vlgmr.msra.gmra.mxu3 %vm442_vm1, %v437_v2  ;;  %1223 = vmatpush.msk.msra.mxu1 %vm491_vm0, %v441_v0  ;;  %v430_v8 = vld [vmem:[%s1741_s4 + $0x28] sm:$0xff]  ;;  %v431_v12 = vld [vmem:[%s1741_s4 + $0x30] sm:$0xff] }
  0x1f   : > { %v429_v4 = vld [vmem:[%s1741_s4 + $0x20] sm:$0xff]  ;;  %1166 = vmatmul.msk.f32.vlgmr.msra.gmra.mxu0 %vm442_vm1, %v425_v3  ;;  %v436_v13 = vld [vmem:[%s1741_s4 + $0x58] sm:$0xff] }
  0x20   : > { %1170 = vmatmul.msk.f32.vlgmr.msra.gmra.mxu1 %vm442_vm1, %v429_v4  ;;  %v440_v14 = vld [vmem:[%s1741_s4 + $0x78] sm:$0xff] }
  0x21   : > { %v428_v15 = vld [vmem:[%s1741_s4 + $0x18] sm:$0xff] }
  0x22   : > { %v432_v16 = vld [vmem:[%s1741_s4 + $0x38] sm:$0xff] }
  0x25   : > { %1175 = vmatmul.msk.f32.gmra.mxu2 %vm442_vm1, %v434_v5 }
  0x26   : > { %1179 = vmatmul.msk.f32.gmra.mxu3 %vm442_vm1, %v438_v6 }
  0x27   : > { %1167 = vmatmul.msk.f32.gmra.mxu0 %vm442_vm1, %v426_v7 }
  0x28   : > { %1171 = vmatmul.msk.f32.gmra.mxu1 %vm442_vm1, %v430_v8 }
  0x2d   : > { %1176 = vmatmul.msk.f32.gmra.mxu2 %vm442_vm1, %v435_v9 }
  0x2e   : > { %1180 = vmatmul.msk.f32.gmra.mxu3 %vm442_vm1, %v439_v10 }
  0x2f   : > { %1168 = vmatmul.msk.f32.gmra.mxu0 %vm442_vm1, %v427_v11 }
  0x30   : > { %1172 = vmatmul.msk.f32.gmra.mxu1 %vm442_vm1, %v431_v12 }
  0x35   : > { %1177 = vmatmul.msk.f32.gmra.mxu2 %vm442_vm1, %v436_v13 }
  0x36   : > { %1181 = vmatmul.msk.f32.gmra.mxu3 %vm442_vm1, %v440_v14 }
  0x37   : > { %1169 = vmatmul.msk.f32.gmra.mxu0 %vm442_vm1, %v428_v15 }
  0x38   : > { %1173 = vmatmul.msk.f32.gmra.mxu1 %vm442_vm1, %v432_v16 }
  0x9c   : > { %v512_v17 = vpop.f32.mrf.mxu0 }
  0x9d   : > { %v524_v18 = vpop.f32.mrf.mxu1  ;;  %v560_v19 = vmul.f32 1.442695, %v512_v17 }
  0x9e   : > { %v568_v20 = vmul.f32 1.442695, %v524_v18 }
  0x9f   : > { %1285 = vpow2.f32 %v560_v19 }
  0xa0   : > { %1287 = vpow2.f32 %v568_v20  ;;  %v536_v21 = vpop.f32.mrf.mxu2 }
  0xa1   : > { %v548_v22 = vpop.f32.mrf.mxu3  ;;  %v576_v23 = vmul.f32 1.442695, %v536_v21 }
  0xa2   : > { %v584_v24 = vmul.f32 1.442695, %v548_v22 }
  0xa3   : > { %1289 = vpow2.f32 %v576_v23 }
  0xa4   : > { %1291 = vpow2.f32 %v584_v24  ;;  %v515_v25 = vpop.f32.mrf.mxu0 }
  0xa5   : > { %v527_v26 = vpop.f32.mrf.mxu1  ;;  %v1286_v27 = vpop.eup %1285  ;;  %v562_v28 = vmul.f32 1.442695, %v515_v25 }
  0xa6   : > { %v570_v29 = vmul.f32 1.442695, %v527_v26  ;;  %v1288_v30 = vpop.eup %1287  ;;  %592 = vst [vmem:[#allocation2 + $0x30] sm:$0xff] %v1286_v27 }
  0xa7   : > { %596 = vst [vmem:[#allocation2 + $0x50] sm:$0xff] %v1288_v30  ;;  %1293 = vpow2.f32 %v562_v28 }
  0xa8   : > { %1295 = vpow2.f32 %v570_v29  ;;  %v539_v31 = vpop.f32.mrf.mxu2 }
  0xa9   : > { %v551_v32 = vpop.f32.mrf.mxu3  ;;  %v1290_v33 = vpop.eup %1289  ;;  %v578_v34 = vmul.f32 1.442695, %v539_v31 }
  0xaa   : > { %v586_v35 = vmul.f32 1.442695, %v551_v32  ;;  %v1292_v36 = vpop.eup %1291  ;;  %600 = vst [vmem:[#allocation2 + $0x40] sm:$0xff] %v1290_v33 }
  0xab   : > { %604 = vst [vmem:[#allocation2 + $0x60] sm:$0xff] %v1292_v36  ;;  %1297 = vpow2.f32 %v578_v34 }
  0xac   : > { %1299 = vpow2.f32 %v586_v35  ;;  %v518_v37 = vpop.f32.mrf.mxu0 }
  0xad   : > { %v530_v38 = vpop.f32.mrf.mxu1  ;;  %v1294_v39 = vpop.eup %1293  ;;  %v564_v40 = vmul.f32 1.442695, %v518_v37 }
  0xae   : > { %v572_v41 = vmul.f32 1.442695, %v530_v38  ;;  %v1296_v42 = vpop.eup %1295  ;;  %593 = vst [vmem:[#allocation2] sm:$0xff] %v1294_v39 }
  0xaf   : > { %597 = vst [vmem:[#allocation2 + $0x68] sm:$0xff] %v1296_v42  ;;  %1301 = vpow2.f32 %v564_v40 }
  0xb0   : > { %1303 = vpow2.f32 %v572_v41  ;;  %v542_v43 = vpop.f32.mrf.mxu2 }
  0xb1   : > { %v554_v44 = vpop.f32.mrf.mxu3  ;;  %v1298_v45 = vpop.eup %1297  ;;  %v580_v46 = vmul.f32 1.442695, %v542_v43 }
  0xb2   : > { %v588_v47 = vmul.f32 1.442695, %v554_v44  ;;  %v1300_v48 = vpop.eup %1299  ;;  %601 = vst [vmem:[#allocation2 + $0x20] sm:$0xff] %v1298_v45 }
  0xb3   : > { %605 = vst [vmem:[#allocation2 + $0x70] sm:$0xff] %v1300_v48  ;;  %1305 = vpow2.f32 %v580_v46 }
  0xb4   : > { %1307 = vpow2.f32 %v588_v47  ;;  %v521_v49 = vpop.f32.mrf.mxu0 }
  0xb5   : > { %v533_v50 = vpop.f32.mrf.mxu1  ;;  %v1302_v51 = vpop.eup %1301  ;;  %v566_v52 = vmul.f32 1.442695, %v521_v49 }
  0xb6   : > { %v574_v53 = vmul.f32 1.442695, %v533_v50  ;;  %v1304_v54 = vpop.eup %1303  ;;  %594 = vst [vmem:[#allocation2 + $0x58] sm:$0xff] %v1302_v51 }
  0xb7   : > { %598 = vst [vmem:[#allocation2 + $0x8] sm:$0xff] %v1304_v54  ;;  %1309 = vpow2.f32 %v566_v52 }
  0xb8   : > { %1311 = vpow2.f32 %v574_v53  ;;  %v545_v55 = vpop.f32.mrf.mxu2 }
  0xb9   : > { %v557_v56 = vpop.f32.mrf.mxu3  ;;  %v1306_v57 = vpop.eup %1305  ;;  %v582_v58 = vmul.f32 1.442695, %v545_v55 }
  0xba   : > { %v590_v59 = vmul.f32 1.442695, %v557_v56  ;;  %v1308_v60 = vpop.eup %1307  ;;  %602 = vst [vmem:[#allocation2 + $0x10] sm:$0xff] %v1306_v57 }
  0xbb   : > { %606 = vst [vmem:[#allocation2 + $0x78] sm:$0xff] %v1308_v60  ;;  %1313 = vpow2.f32 %v582_v58 }
  0xbc   : > { %1315 = vpow2.f32 %v590_v59 }
  0xbd   : > { %v1310_v61 = vpop.eup %1309 }
  0xbe   : > { %v1312_v62 = vpop.eup %1311  ;;  %595 = vst [vmem:[#allocation2 + $0x18] sm:$0xff] %v1310_v61 }
  0xbf   : > { %599 = vst [vmem:[#allocation2 + $0x48] sm:$0xff] %v1312_v62 }
  0xc1   : > { %v1314_v63 = vpop.eup %1313 }
  0xc2   : > { %v1316_v0 = vpop.eup %1315  ;;  %603 = vst [vmem:[#allocation2 + $0x38] sm:$0xff] %v1314_v63 }
  0xc3   : > { %607 = vst [vmem:[#allocation2 + $0x28] sm:$0xff] %v1316_v0 }
  0xc4 PF: > { %v624_v1 = vld [vmem:[%s1534_s27] sm:$0xff]  ;;  %vm625_vm2 = vcmask 64512   ;;  %vm869_vm3 = vcmask 1045504   ;;  %vm820_vm4 = vcmask 48128   ;;  %v617_v7 = vld [vmem:[%s1529_s18 + $0x48] sm:$0xff]  ;;  %v618_v11 = vld [vmem:[%s1529_s18 + $0x50] sm:$0xff] }
  0xc5   : > { %v616_v2 = vld [vmem:[%s1529_s18 + $0x40] sm:$0xff]  ;;  %1226 = vmatpush.msra.mxu2 %v624_v1  ;;  %689 = vmatpush.msra.mxu0 %v624_v1  ;;  %v609_v8 = vld [vmem:[%s1529_s18 + $0x8] sm:$0xff]  ;;  %v610_v12 = vld [vmem:[%s1529_s18 + $0x10] sm:$0xff]  ;;  %s986_s17 = sshll.u32 %s1546_s13, 4  ;;  %s1369_s12 = scalar_lea.hbm %s1743_s6, 256  ;;  %s987_s17 = int_to_ptr.vmem [resolvable:$true] %s986_s17 }
  0xc6   : > { %v608_v3 = vld [vmem:[%s1529_s18] sm:$0xff]  ;;  %1190 = vmatmul.msk.f32.vlgmr.msra.gmra.mxu2 %vm625_vm2, %v616_v2  ;;  %v812_v9 = vld [vmem:[%s1539_s8 + $0x48] sm:$0xff]  ;;  %v813_v13 = vld [vmem:[%s1539_s8 + $0x50] sm:$0xff] }
  0xc7   : > { %v819_v4 = vld [vmem:[%s1544_s25] sm:$0x3f]  ;;  %1182 = vmatmul.msk.f32.vlgmr.msra.gmra.mxu0 %vm625_vm2, %v608_v3  ;;  %v804_v10 = vld [vmem:[%s1539_s8 + $0x8] sm:$0xff]  ;;  %v805_v14 = vld [vmem:[%s1539_s8 + $0x10] sm:$0xff]  ;;  %s1222_s25 = sshll.u32 %s1419_s24, 7  ;;  %s1751_s24 = sand.u32 1, %s1411_s22  }
  0xc8   : > { %v811_v5 = vld [vmem:[%s1539_s8 + $0x40] sm:$0xff]  ;;  %1227 = vmatpush.msk.msra.mxu3 %vm869_vm3, %v819_v4  ;;  %1198 = vmatpush.msk.msra.mxu1 %vm869_vm3, %v819_v4  ;;  %v619_v15 = vld [vmem:[%s1529_s18 + $0x58] sm:$0xff]  ;;  %v621_v23 = vld [vmem:[%s1529_s18 + $0x68] sm:$0xff]  ;;  %s971_s20 = scalar_lea.sflag [#allocation4], %s1751_s24 }
  0xc9   : > { %v803_v6 = vld [vmem:[%s1539_s8] sm:$0xff]  ;;  %1207 = vmatmul.msk.f32.vlgmr.msra.gmra.mxu3 %vm820_vm4, %v811_v5  ;;  %v611_v16 = vld [vmem:[%s1529_s18 + $0x18] sm:$0xff]  ;;  %v613_v24 = vld [vmem:[%s1529_s18 + $0x28] sm:$0xff] }
  0xca   : > { %1199 = vmatmul.msk.f32.vlgmr.msra.gmra.mxu1 %vm820_vm4, %v803_v6  ;;  %v814_v17 = vld [vmem:[%s1539_s8 + $0x58] sm:$0xff]  ;;  %v620_v19 = vld [vmem:[%s1529_s18 + $0x60] sm:$0xff]  ;;  %v816_v25 = vld [vmem:[%s1539_s8 + $0x68] sm:$0xff] }
  0xcb   : > { %v806_v18 = vld [vmem:[%s1539_s8 + $0x18] sm:$0xff]  ;;  %v612_v20 = vld [vmem:[%s1529_s18 + $0x20] sm:$0xff]  ;;  %v808_v26 = vld [vmem:[%s1539_s8 + $0x28] sm:$0xff] }
  0xcc   : > { %v815_v21 = vld [vmem:[%s1539_s8 + $0x60] sm:$0xff]  ;;  %v622_v27 = vld [vmem:[%s1529_s18 + $0x70] sm:$0xff]  ;;  %v623_v31 = vld [vmem:[%s1529_s18 + $0x78] sm:$0xff] }
  0xcd   : > { %v807_v22 = vld [vmem:[%s1539_s8 + $0x20] sm:$0xff]  ;;  %v614_v28 = vld [vmem:[%s1529_s18 + $0x30] sm:$0xff]  ;;  %v615_v32 = vld [vmem:[%s1529_s18 + $0x38] sm:$0xff] }
  0xce   : > { %1191 = vmatmul.msk.f32.gmra.mxu2 %vm625_vm2, %v617_v7  ;;  %v817_v29 = vld [vmem:[%s1539_s8 + $0x70] sm:$0xff]  ;;  %v818_v33 = vld [vmem:[%s1539_s8 + $0x78] sm:$0xff]  ;;  %v779_v48 = vld [vmem:[#allocation2 + $0x40] sm:$0xff] }
  0xcf   : > { %1183 = vmatmul.msk.f32.gmra.mxu0 %vm625_vm2, %v609_v8  ;;  %v809_v30 = vld [vmem:[%s1539_s8 + $0x30] sm:$0xff]  ;;  %v810_v34 = vld [vmem:[%s1539_s8 + $0x38] sm:$0xff]  ;;  %v772_v52 = vld [vmem:[#allocation2] sm:$0xff]  ;;  %s985_s8 = scalar_lea.hbm %s1743_s6, %s1222_s25 }
  0xd0   : > { %v771_v40 = vld [vmem:[#allocation2 + $0x30] sm:$0xff]  ;;  %v780_v62 = vld [vmem:[#allocation2 + $0x20] sm:$0xff]  ;;  %v773_v2 = vld [vmem:[#allocation2 + $0x58] sm:$0xff]  ;;  %s988_s19 = sshll.u32 %s985_s8, 4  ;;  %s989_s19 = int_to_ptr.hbm [resolvable:$true] %s988_s19 }
  0xd1   : > { %1208 = vmatmul.msk.f32.gmra.mxu3 %vm820_vm4, %v812_v9  ;;  %s1363_s14 = sshra.s32 %s989_s19, 4  ;;  %s1364_s14 = int_to_ptr.hbm [resolvable:$true] %s1363_s14 }
  0xd2   : > { %1200 = vmatmul.msk.f32.gmra.mxu1 %vm820_vm4, %v804_v10  ;;  %s1365_s28 = scalar_lea.hbm %s1364_s14, 128  ;;  %p1370_p2 = scmp.lt.s32.totalorder %s1364_s14, %s1743_s6 }
  0xd3   : > { %p1366_p13 = scmp.ne.s32.totalorder %s1364_s14, %s1365_s28  ;;  %p1371_p3 = scmp.lt.s32.totalorder %s1369_s12, %s1365_s28 }
  0xd5   : > { %p1367_p0 = pnand %p1366_p13, %p1506_p4  ;;  %p1372_p5 = por %p1371_p3, %p1370_p2 }
  0xd6   : > { %1192 = vmatmul.msk.f32.gmra.mxu2 %vm625_vm2, %v618_v11 }
  0xd7   : > { %1184 = vmatmul.msk.f32.gmra.mxu0 %vm625_vm2, %v610_v12  ;;  %v781_v12 = vld [vmem:[#allocation2 + $0x10] sm:$0xff]  ;;  %p1368_p1 = pneg %p1367_p0 }
  0xd9   : > { %1209 = vmatmul.msk.f32.gmra.mxu3 %vm820_vm4, %v813_v13  ;;  %p1373_p6 = pnand %p1372_p5, %p1368_p1 }
  0xda   : > { %1201 = vmatmul.msk.f32.gmra.mxu1 %vm820_vm4, %v805_v14 }
  0xde   : > { %1193 = vmatmul.msk.f32.gmra.mxu2 %vm625_vm2, %v619_v15 }
  0xdf   : > { %1185 = vmatmul.msk.f32.gmra.mxu0 %vm625_vm2, %v611_v16  ;;  %v774_v16 = vld [vmem:[#allocation2 + $0x18] sm:$0xff] }
  0xe1   : > { %1210 = vmatmul.msk.f32.gmra.mxu3 %vm820_vm4, %v814_v17 }
  0xe2   : > { %1202 = vmatmul.msk.f32.gmra.mxu1 %vm820_vm4, %v806_v18 }
  0xe6   : > { %1194 = vmatmul.msk.f32.gmra.mxu2 %vm625_vm2, %v620_v19 }
  0xe7   : > { %1186 = vmatmul.msk.f32.gmra.mxu0 %vm625_vm2, %v612_v20 }
  0xe9   : > { %1211 = vmatmul.msk.f32.gmra.mxu3 %vm820_vm4, %v815_v21 }
  0xea   : > { %1203 = vmatmul.msk.f32.gmra.mxu1 %vm820_vm4, %v807_v22 }
  0xee   : > { %1195 = vmatmul.msk.f32.gmra.mxu2 %vm625_vm2, %v621_v23 }
  0xef   : > { %1187 = vmatmul.msk.f32.gmra.mxu0 %vm625_vm2, %v613_v24 }
  0xf1   : > { %1212 = vmatmul.msk.f32.gmra.mxu3 %vm820_vm4, %v816_v25 }
  0xf2   : > { %1204 = vmatmul.msk.f32.gmra.mxu1 %vm820_vm4, %v808_v26  ;;  %v782_v26 = vld [vmem:[#allocation2 + $0x38] sm:$0xff] }
  0xf6   : > { %1196 = vmatmul.msk.f32.gmra.mxu2 %vm625_vm2, %v622_v27 }
  0xf7   : > { %1188 = vmatmul.msk.f32.gmra.mxu0 %vm625_vm2, %v614_v28 }
  0xf9   : > { %1213 = vmatmul.msk.f32.gmra.mxu3 %vm820_vm4, %v817_v29 }
  0xfa   : > { %1205 = vmatmul.msk.f32.gmra.mxu1 %vm820_vm4, %v809_v30  ;;  %v775_v30 = vld [vmem:[#allocation2 + $0x50] sm:$0xff] }
  0xfe   : > { %1197 = vmatmul.msk.f32.gmra.mxu2 %vm625_vm2, %v623_v31 }
  0xff   : > { %1189 = vmatmul.msk.f32.gmra.mxu0 %vm625_vm2, %v615_v32 }
 0x101   : > { %1214 = vmatmul.msk.f32.gmra.mxu3 %vm820_vm4, %v818_v33 }
 0x102   : > { %1206 = vmatmul.msk.f32.gmra.mxu1 %vm820_vm4, %v810_v34 }
 0x144   : > { %v691_v35 = vpop.f32.mrf.mxu0 }
 0x145   : > { %v739_v36 = vmul.f32 1.442695, %v691_v35 }
 0x147   : > { %v890_v37 = vpop.f32.mrf.mxu1  ;;  %1317 = vpow2.f32 %v739_v36 }
 0x149   : > { %v715_v38 = vpop.f32.mrf.mxu2 }
 0x14a   : > { %v755_v39 = vmul.f32 1.442695, %v715_v38 }
 0x14c   : > { %v694_v41 = vpop.f32.mrf.mxu0  ;;  %v914_v42 = vpop.f32.mrf.mxu3  ;;  %1319 = vpow2.f32 %v755_v39  ;;  %v783_v39 = vld [vmem:[#allocation2 + $0x60] sm:$0xff] }
 0x14d   : > { %v1318_v43 = vpop.eup %1317  ;;  %v741_v44 = vmul.f32 1.442695, %v694_v41 }
 0x14e   : > { %v787_v45 = vadd.f32 %v1318_v43, %v771_v40 }
 0x14f   : > { %v893_v46 = vpop.f32.mrf.mxu1  ;;  %1321 = vpow2.f32 %v741_v44  ;;  %v776_v44 = vld [vmem:[#allocation2 + $0x68] sm:$0xff] }
 0x150   : > { %v938_v47 = vmul.f32 %v890_v37, %v787_v45 }
 0x151   : > { %v718_v49 = vpop.f32.mrf.mxu2 }
 0x152   : > { %954 = vst [vmem:[%s1546_s13] sm:$0xff] %v938_v47  ;;  %v1320_v50 = vpop.eup %1319  ;;  %v757_v51 = vmul.f32 1.442695, %v718_v49 }
 0x153   : > { %v795_v53 = vadd.f32 %v1320_v50, %v779_v48 }
 0x154   : > { %v697_v54 = vpop.f32.mrf.mxu0  ;;  %v917_v55 = vpop.f32.mrf.mxu3  ;;  %1323 = vpow2.f32 %v757_v51 }
 0x155   : > { %v1322_v56 = vpop.eup %1321  ;;  %v743_v57 = vmul.f32 1.442695, %v697_v54  ;;  %v946_v58 = vmul.f32 %v914_v42, %v795_v53  ;;  %v784_v53 = vld [vmem:[#allocation2 + $0x70] sm:$0xff] }
 0x156   : > { %v788_v59 = vadd.f32 %v1322_v56, %v772_v52 }
 0x157   : > { %v896_v60 = vpop.f32.mrf.mxu1  ;;  %1325 = vpow2.f32 %v743_v57  ;;  %962 = vst [vmem:[%s1546_s13 + $0x40] sm:$0xff] %v946_v58  ;;  %v777_v57 = vld [vmem:[#allocation2 + $0x8] sm:$0xff] }
 0x158   : > { %v939_v61 = vmul.f32 %v893_v46, %v788_v59 }
 0x159   : > { %v721_v63 = vpop.f32.mrf.mxu2 }
 0x15a   : > { %955 = vst [vmem:[%s1546_s13 + $0x8] sm:$0xff] %v939_v61  ;;  %v1324_v0 = vpop.eup %1323  ;;  %v759_v1 = vmul.f32 1.442695, %v721_v63 }
 0x15b   : > { %v796_v3 = vadd.f32 %v1324_v0, %v780_v62 }
 0x15c   : > { %v700_v4 = vpop.f32.mrf.mxu0  ;;  %v920_v5 = vpop.f32.mrf.mxu3  ;;  %1327 = vpow2.f32 %v759_v1 }
 0x15d   : > { %v1326_v6 = vpop.eup %1325  ;;  %v745_v7 = vmul.f32 1.442695, %v700_v4  ;;  %v947_v8 = vmul.f32 %v917_v55, %v796_v3 }
 0x15e   : > { %v789_v9 = vadd.f32 %v1326_v6, %v773_v2  ;;  %v785_v2 = vld [vmem:[#allocation2 + $0x78] sm:$0xff] }
 0x15f   : > { %v899_v10 = vpop.f32.mrf.mxu1  ;;  %1329 = vpow2.f32 %v745_v7  ;;  %963 = vst [vmem:[%s1546_s13 + $0x48] sm:$0xff] %v947_v8  ;;  %v778_v7 = vld [vmem:[#allocation2 + $0x48] sm:$0xff] }
 0x160   : > { %v940_v11 = vmul.f32 %v896_v60, %v789_v9 }
 0x161   : > { %v724_v13 = vpop.f32.mrf.mxu2 }
 0x162   : > { %956 = vst [vmem:[%s1546_s13 + $0x10] sm:$0xff] %v940_v11  ;;  %v1328_v14 = vpop.eup %1327  ;;  %v761_v15 = vmul.f32 1.442695, %v724_v13 }
 0x163   : > { %v797_v17 = vadd.f32 %v1328_v14, %v781_v12  ;;  %v786_v14 = vld [vmem:[#allocation2 + $0x28] sm:$0xff] }
 0x164   : > { %v703_v18 = vpop.f32.mrf.mxu0  ;;  %v923_v19 = vpop.f32.mrf.mxu3  ;;  %1331 = vpow2.f32 %v761_v15 }
 0x165   : > { %v1330_v20 = vpop.eup %1329  ;;  %v747_v21 = vmul.f32 1.442695, %v703_v18  ;;  %v948_v22 = vmul.f32 %v920_v5, %v797_v17 }
 0x166   : > { %v790_v23 = vadd.f32 %v1330_v20, %v774_v16 }
 0x167   : > { %1333 = vpow2.f32 %v747_v21  ;;  %v902_v24 = vpop.f32.mrf.mxu1  ;;  %964 = vst [vmem:[%s1546_s13 + $0x50] sm:$0xff] %v948_v22 }
 0x168   : > { %v941_v25 = vmul.f32 %v899_v10, %v790_v23 }
 0x169   : > { %v727_v27 = vpop.f32.mrf.mxu2 }
 0x16a   : > { %957 = vst [vmem:[%s1546_s13 + $0x18] sm:$0xff] %v941_v25  ;;  %v1332_v28 = vpop.eup %1331  ;;  %v763_v29 = vmul.f32 1.442695, %v727_v27 }
 0x16b   : > { %v798_v31 = vadd.f32 %v1332_v28, %v782_v26 }
 0x16c   : > { %v706_v32 = vpop.f32.mrf.mxu0  ;;  %1335 = vpow2.f32 %v763_v29  ;;  %v926_v35 = vpop.f32.mrf.mxu3 }
 0x16d   : > { %v1334_v33 = vpop.eup %1333  ;;  %v749_v34 = vmul.f32 1.442695, %v706_v32  ;;  %v949_v36 = vmul.f32 %v923_v19, %v798_v31 }
 0x16e   : > { %v791_v37 = vadd.f32 %v1334_v33, %v775_v30 }
 0x16f   : > { %1337 = vpow2.f32 %v749_v34  ;;  %965 = vst [vmem:[%s1546_s13 + $0x58] sm:$0xff] %v949_v36  ;;  %v905_v40 = vpop.f32.mrf.mxu1 }
 0x170   : > { %v942_v38 = vmul.f32 %v902_v24, %v791_v37 }
 0x171   : > { %v730_v41 = vpop.f32.mrf.mxu2 }
 0x172   : > { %958 = vst [vmem:[%s1546_s13 + $0x20] sm:$0xff] %v942_v38  ;;  %v1336_v42 = vpop.eup %1335  ;;  %v765_v43 = vmul.f32 1.442695, %v730_v41 }
 0x173   : > { %v799_v45 = vadd.f32 %v1336_v42, %v783_v39 }
 0x174   : > { %v709_v46 = vpop.f32.mrf.mxu0  ;;  %1339 = vpow2.f32 %v765_v43  ;;  %v929_v51 = vpop.f32.mrf.mxu3 }
 0x175   : > { %v1338_v47 = vpop.eup %1337  ;;  %v751_v48 = vmul.f32 1.442695, %v709_v46  ;;  %v950_v49 = vmul.f32 %v926_v35, %v799_v45 }
 0x176   : > { %v792_v50 = vadd.f32 %v1338_v47, %v776_v44 }
 0x177   : > { %1341 = vpow2.f32 %v751_v48  ;;  %966 = vst [vmem:[%s1546_s13 + $0x60] sm:$0xff] %v950_v49  ;;  %v908_v58 = vpop.f32.mrf.mxu1 }
 0x178   : > { %v943_v52 = vmul.f32 %v905_v40, %v792_v50 }
 0x179   : > { %v733_v54 = vpop.f32.mrf.mxu2 }
 0x17a   : > { %959 = vst [vmem:[%s1546_s13 + $0x28] sm:$0xff] %v943_v52  ;;  %v1340_v55 = vpop.eup %1339  ;;  %v767_v56 = vmul.f32 1.442695, %v733_v54 }
 0x17b   : > { %v800_v59 = vadd.f32 %v1340_v55, %v784_v53 }
 0x17c   : > { %v712_v60 = vpop.f32.mrf.mxu0  ;;  %1343 = vpow2.f32 %v767_v56  ;;  %v932_v3 = vpop.f32.mrf.mxu3 }
 0x17d   : > { %v1342_v61 = vpop.eup %1341  ;;  %v753_v62 = vmul.f32 1.442695, %v712_v60  ;;  %v951_v63 = vmul.f32 %v929_v51, %v800_v59 }
 0x17e   : > { %v793_v0 = vadd.f32 %v1342_v61, %v777_v57 }
 0x17f   : > { %1345 = vpow2.f32 %v753_v62  ;;  %967 = vst [vmem:[%s1546_s13 + $0x68] sm:$0xff] %v951_v63  ;;  %v911_v10 = vpop.f32.mrf.mxu1 }
 0x180   : > { %v944_v1 = vmul.f32 %v908_v58, %v793_v0 }
 0x181   : > { %v736_v4 = vpop.f32.mrf.mxu2 }
 0x182   : > { %960 = vst [vmem:[%s1546_s13 + $0x30] sm:$0xff] %v944_v1  ;;  %v1344_v5 = vpop.eup %1343  ;;  %v769_v6 = vmul.f32 1.442695, %v736_v4 }
 0x183   : > { %v801_v8 = vadd.f32 %v1344_v5, %v785_v2 }
 0x184   : > { %1347 = vpow2.f32 %v769_v6  ;;  %v935_v16 = vpop.f32.mrf.mxu3 }
 0x185   : > { %v1346_v9 = vpop.eup %1345  ;;  %v952_v11 = vmul.f32 %v932_v3, %v801_v8 }
 0x186   : > { %v794_v12 = vadd.f32 %v1346_v9, %v778_v7 }
 0x187   : > { %968 = vst [vmem:[%s1546_s13 + $0x70] sm:$0xff] %v952_v11 }
 0x188   : > { %v945_v13 = vmul.f32 %v911_v10, %v794_v12 }
 0x18a   : > { %961 = vst [vmem:[%s1546_s13 + $0x38] sm:$0xff] %v945_v13  ;;  %v1348_v15 = vpop.eup %1347 }
 0x18b   : > { %v802_v17 = vadd.f32 %v1348_v15, %v786_v14 }
 0x18d   : > { %v953_v18 = vmul.f32 %v935_v16, %v802_v17 }
 0x18f   : > { %969 = vst [vmem:[%s1546_s13 + $0x78] sm:$0xff] %v953_v18 }
 0x190   : > { %1376 = shalt.err (!%p1373_p6)
}
 0x191   : > { %s1429_s13 = smov 128   ;;  %s1430_s16 = smov 8  }
 0x192   : > { %1228 = dma.vmem_to_hbm [thread:$0]  (%p1506_p4), %s987_s17, 2048, %s989_s19, %s971_s20, %s1429_s13, %s1429_s13, %s1430_s16  }
 0x193 PF: > { %p1234_p7 = scmp.ge.s32.totalorder %s1427_s26, 2  ;;  %s1003_s25 = sand.u32 1, %s1407_s21  }
 0x194   : > { %s1004_s18 = scalar_lea.sflag [#allocation4], %s1003_s25 }
 0x195   : > { %p1231_p9 = pnand %p1234_p7, %p1513_p8 }
 0x197   : > { %p1232_p10 = pneg %p1231_p9 }
 0x199   : > { %1402 = dma.done.wait (%p1232_p10), %s1004_s18, 2048  }
 0x19a   : > { %1404 = vsyncadd (%p1232_p10), %s1004_s18, 4294965248  ;;  %s19_s26 = sadd.s32 1, %s1427_s26   ;;  %s1752_s24 = sld [smem:[#allocation6_spill]] }
 0x19b   : > { %p16_p11 = scmp.ge.s32.totalorder %s19_s26, 4   ;;  %s1753_s25 = sld [smem:[#allocation7_spill]] }
 0x19c   : > { %s1754_s21 = smov %s1411_s22  ;;  %s1755_s22 = smov %s1415_s23 }
 0x19d   : > { %s1756_s23 = smov %s1519_s10  ;;  %18 = sbr.rel (!%p16_p11) target bundleno = 4 (0x4), region = 98 }
 0x1a2   :  { %1010 = vsyncpa [#allocation4], 1 }
 0x1a3   :  { %1012 = vsyncpa [#allocation4 + $0x1], 1 }

</bundles_post_ra>
